<compile_context>
chip_gen: v7x
topology: tpu7x:2x2x1
jax: 0.10.0
libtpu: 0.0.40
codegen_flags: <defaults>
</compile_context>

<pallas_src>
import functools

import jax
import jax.numpy as jnp
from jax.experimental import pallas as pl
from jax.experimental.pallas import tpu as pltpu

PAD = 128  # lane width; every feature dim is padded to this


def nest_mlp_kernel(x_ref, w_ref, b_ref, o_ref):
    # x_ref: (TM, 128)        batch tile, zero-padded cols d_in..127
    # w_ref: (3, 128, 128)    packed zero-padded weights (VMEM-resident)
    # b_ref: (8, 128)         rows 0..2 hold the zero-padded biases (f32)
    # o_ref: (TM, 128)        lane-dense output slab (cols 16..127 are zero)
    cdt = w_ref.dtype                       # MXU operand dtype (f32 or bf16)
    x = x_ref[...]
    b = b_ref[...]                          # single (8,128) vreg load

    # Layer 1: (TM,128) @ (128,128) -> f32 acc; bias + ReLU in f32 on the VPU.
    h = jnp.dot(x, w_ref[0], preferred_element_type=jnp.float32)
    h = jnp.maximum(h + b[0:1, :], 0.0)

    # Layer 2
    h = jnp.dot(h.astype(cdt), w_ref[1], preferred_element_type=jnp.float32)
    h = jnp.maximum(h + b[1:2, :], 0.0)

    # Layer 3 (no ReLU)
    h = jnp.dot(h.astype(cdt), w_ref[2], preferred_element_type=jnp.float32)
    h = h + b[2:3, :]

    o_ref[...] = h.astype(o_ref.dtype)


def _round_up(v, m):
    return (v + m - 1) // m * m


@functools.partial(jax.jit, static_argnames=("tm_max", "compute_dtype"))
def nest_mlp(x, w1, b1, w2, b2, w3, b3, *, tm_max=512, compute_dtype=None):
    """Fused NestMLP forward.  x: (B, 20) f32.  Returns (B, 16) f32."""
    B, d_in = x.shape
    d_out = w3.shape[1]
    compute_dtype = compute_dtype or x.dtype

    # Batch padding: multiple of 8 (sublane), then tile with TM <= tm_max rows.
    # With TM=512: x/out double buffers = 4 * 512*128*4B = 1 MiB, weights+bias
    # ~0.2 MiB -> far under any VMEM limit.
    B8 = max(8, _round_up(B, 8))
    TM = min(tm_max, B8)
    B_pad = _round_up(B8, TM)

    # Lane-dense, zero-padded operands.
    x_p = jnp.zeros((B_pad, PAD), compute_dtype).at[:B, :d_in].set(
        x.astype(compute_dtype))

    w_packed = jnp.zeros((3, PAD, PAD), compute_dtype)
    w_packed = w_packed.at[0, : w1.shape[0], : w1.shape[1]].set(w1.astype(compute_dtype))
    w_packed = w_packed.at[1, : w2.shape[0], : w2.shape[1]].set(w2.astype(compute_dtype))
    w_packed = w_packed.at[2, : w3.shape[0], : w3.shape[1]].set(w3.astype(compute_dtype))

    b_packed = jnp.zeros((8, PAD), jnp.float32)
    b_packed = b_packed.at[0, : b1.shape[-1]].set(b1.reshape(-1).astype(jnp.float32))
    b_packed = b_packed.at[1, : b2.shape[-1]].set(b2.reshape(-1).astype(jnp.float32))
    b_packed = b_packed.at[2, : b3.shape[-1]].set(b3.reshape(-1).astype(jnp.float32))

    out_padded = pl.pallas_call(
        nest_mlp_kernel,
        out_shape=jax.ShapeDtypeStruct((B_pad, PAD), jnp.float32),
        grid=(B_pad // TM,),
        in_specs=[
            # x: batch-tiled, double-buffered by the pipeline.
            pl.BlockSpec((TM, PAD), lambda i: (i, 0)),
            # packed weights / biases: same block every grid step -> VMEM-resident.
            pl.BlockSpec((3, PAD, PAD), lambda i: (0, 0, 0)),
            pl.BlockSpec((8, PAD), lambda i: (0, 0)),
        ],
        out_specs=pl.BlockSpec((TM, PAD), lambda i: (i, 0)),
        compiler_params=pltpu.CompilerParams(
            dimension_semantics=("parallel",)),  # batch axis -> both TCs on v7x
    )(x_p, w_packed, b_packed)

    return out_padded[:B, :d_out]


def init_params(key):
    """Deterministic parameter init mimicking nn.Linear's U(-1/sqrt(fan_in), ...)."""
    dims = [(20, 64), (64, 32), (32, 16)]
    params = []
    for i, (fan_in, fan_out) in enumerate(dims):
        kw, kb = jax.random.split(jax.random.fold_in(key, i))
        bound = 1.0 / jnp.sqrt(jnp.float32(fan_in))
        w = jax.random.uniform(kw, (fan_in, fan_out), jnp.float32, -bound, bound)
        b = jax.random.uniform(kb, (1, fan_out), jnp.float32, -bound, bound)
        params += [w, b]
    return params


def reference(x, w1, b1, w2, b2, w3, b3):
    h1 = jnp.maximum(x @ w1 + b1, 0.0)
    h2 = jnp.maximum(h1 @ w2 + b2, 0.0)
    return h2 @ w3 + b3


if __name__ == "__main__":
    key = jax.random.PRNGKey(0)
    kx, kp = jax.random.split(key)

    # X = torch.rand(2, 20)  ->  uniform [0, 1) of shape (2, 20)
    x = jax.random.uniform(kx, (2, 20), jnp.float32)
    w1, b1, w2, b2, w3, b3 = init_params(kp)

    ref = reference(x, w1, b1, w2, b2, w3, b3)

    # f32 MXU-operand path (matches the reference to f32 precision).
    out = jax.block_until_ready(nest_mlp(x, w1, b1, w2, b2, w3, b3))
    assert out.shape == (2, 16)
    assert jnp.allclose(out, ref, atol=1e-5, rtol=1e-5)

    # bf16 MXU-operand path (v6e/v7x optimization); f32 accumulation + f32
    # bias/ReLU, so only operand precision differs.
    out_bf16 = jax.block_until_ready(
        nest_mlp(x, w1, b1, w2, b2, w3, b3, compute_dtype=jnp.bfloat16))
    assert out_bf16.shape == (2, 16)
    assert jnp.allclose(out_bf16, ref, atol=1e-1, rtol=5e-2)

    print("KERNEL_OK")
</pallas_src>

<mosaic_0001>
module attributes {stable_mosaic.version = 11 : i64} {
  func.func @nest_mlp_kernel(%arg0: i32, %arg1: memref<8x128xf32, #tpu.memory_space<vmem>>, %arg2: memref<3x128x128xf32, #tpu.memory_space<vmem>>, %arg3: memref<8x128xf32, #tpu.memory_space<vmem>>, %arg4: memref<8x128xf32, #tpu.memory_space<vmem>>) attributes {dimension_semantics = [#tpu.dimension_semantics<parallel>], iteration_bounds = array<i64: 1>, scalar_prefetch = 0 : i64, scratch_operands = 0 : i64, tpu.core_type = #tpu.core_type<tc>, window_params = [{transform_indices = @transform_0, window_bounds = array<i64: 8, 128>}, {pipeline_mode = #tpu.pipeline_mode<synchronous>, transform_indices = @transform_1, window_bounds = array<i64: 3, 128, 128>}, {pipeline_mode = #tpu.pipeline_mode<synchronous>, transform_indices = @transform_2, window_bounds = array<i64: 8, 128>}, {transform_indices = @transform_3, window_bounds = array<i64: 8, 128>}]} {
    %c0 = arith.constant 0 : index
    %c0_0 = arith.constant 0 : index
    %0 = vector.load %arg1[%c0, %c0_0] : memref<8x128xf32, #tpu.memory_space<vmem>>, vector<8x128xf32>
    %c0_1 = arith.constant 0 : index
    %c0_2 = arith.constant 0 : index
    %1 = vector.load %arg3[%c0_1, %c0_2] : memref<8x128xf32, #tpu.memory_space<vmem>>, vector<8x128xf32>
    %c0_3 = arith.constant 0 : index
    %c0_4 = arith.constant 0 : index
    %c0_5 = arith.constant 0 : index
    %2 = vector.load %arg2[%c0_3, %c0_4, %c0_5] : memref<3x128x128xf32, #tpu.memory_space<vmem>>, vector<1x128x128xf32>
    %3 = vector.shape_cast %2 : vector<1x128x128xf32> to vector<128x128xf32>
    %cst = arith.constant dense<0.000000e+00> : vector<8x128xf32>
    %4 = tpu.matmul %0, %3, %cst {dimension_numbers = #tpu.dot_dimension_numbers<[1], [0], [0], [1], [0, 0, 1, 1], [], []>} : vector<8x128xf32>, vector<128x128xf32>, vector<8x128xf32> -> vector<8x128xf32>
    %5 = vector.extract_strided_slice %1 {offsets = [0, 0], sizes = [1, 128], strides = [1, 1]} : vector<8x128xf32> to vector<1x128xf32>
    %6 = vector.broadcast %5 : vector<1x128xf32> to vector<8x128xf32>
    %7 = arith.addf %4, %6 : vector<8x128xf32>
    %cst_6 = arith.constant 0.000000e+00 : f32
    %8 = vector.broadcast %cst_6 : f32 to vector<8x128xf32>
    %9 = arith.maximumf %7, %8 : vector<8x128xf32>
    %c1 = arith.constant 1 : index
    %c0_7 = arith.constant 0 : index
    %c0_8 = arith.constant 0 : index
    %10 = vector.load %arg2[%c1, %c0_7, %c0_8] : memref<3x128x128xf32, #tpu.memory_space<vmem>>, vector<1x128x128xf32>
    %11 = vector.shape_cast %10 : vector<1x128x128xf32> to vector<128x128xf32>
    %cst_9 = arith.constant dense<0.000000e+00> : vector<8x128xf32>
    %12 = tpu.matmul %9, %11, %cst_9 {dimension_numbers = #tpu.dot_dimension_numbers<[1], [0], [0], [1], [0, 0, 1, 1], [], []>} : vector<8x128xf32>, vector<128x128xf32>, vector<8x128xf32> -> vector<8x128xf32>
    %13 = vector.extract_strided_slice %1 {offsets = [1, 0], sizes = [1, 128], strides = [1, 1]} : vector<8x128xf32> to vector<1x128xf32>
    %14 = vector.broadcast %13 : vector<1x128xf32> to vector<8x128xf32>
    %15 = arith.addf %12, %14 : vector<8x128xf32>
    %cst_10 = arith.constant 0.000000e+00 : f32
    %16 = vector.broadcast %cst_10 : f32 to vector<8x128xf32>
    %17 = arith.maximumf %15, %16 : vector<8x128xf32>
    %c2 = arith.constant 2 : index
    %c0_11 = arith.constant 0 : index
    %c0_12 = arith.constant 0 : index
    %18 = vector.load %arg2[%c2, %c0_11, %c0_12] : memref<3x128x128xf32, #tpu.memory_space<vmem>>, vector<1x128x128xf32>
    %19 = vector.shape_cast %18 : vector<1x128x128xf32> to vector<128x128xf32>
    %cst_13 = arith.constant dense<0.000000e+00> : vector<8x128xf32>
    %20 = tpu.matmul %17, %19, %cst_13 {dimension_numbers = #tpu.dot_dimension_numbers<[1], [0], [0], [1], [0, 0, 1, 1], [], []>} : vector<8x128xf32>, vector<128x128xf32>, vector<8x128xf32> -> vector<8x128xf32>
    %21 = vector.extract_strided_slice %1 {offsets = [2, 0], sizes = [1, 128], strides = [1, 1]} : vector<8x128xf32> to vector<1x128xf32>
    %22 = vector.broadcast %21 : vector<1x128xf32> to vector<8x128xf32>
    %23 = arith.addf %20, %22 : vector<8x128xf32>
    %c0_14 = arith.constant 0 : index
    %c0_15 = arith.constant 0 : index
    %24 = vector.load %arg4[%c0_14, %c0_15] : memref<8x128xf32, #tpu.memory_space<vmem>>, vector<8x128xf32>
    tpu.vector_store %arg4[%c0_14, %c0_15], %23 {strides = array<i32>} : memref<8x128xf32, #tpu.memory_space<vmem>>, vector<8x128xf32>,
    return
  }
  func.func @transform_0(%arg0: i32) -> (i32, i32) {
    %c0_i32 = arith.constant 0 : i32
    %c0_i32_0 = arith.constant 0 : i32
    return %arg0, %c0_i32 : i32, i32
  }
  func.func @transform_1(%arg0: i32) -> (i32, i32, i32) {
    %c0_i32 = arith.constant 0 : i32
    %c0_i32_0 = arith.constant 0 : i32
    %c0_i32_1 = arith.constant 0 : i32
    %c0_i32_2 = arith.constant 0 : i32
    return %c0_i32, %c0_i32_0, %c0_i32_1 : i32, i32, i32
  }
  func.func @transform_2(%arg0: i32) -> (i32, i32) {
    %c0_i32 = arith.constant 0 : i32
    %c0_i32_0 = arith.constant 0 : i32
    %c0_i32_1 = arith.constant 0 : i32
    return %c0_i32, %c0_i32_0 : i32, i32
  }
  func.func @transform_3(%arg0: i32) -> (i32, i32) {
    %c0_i32 = arith.constant 0 : i32
    %c0_i32_0 = arith.constant 0 : i32
    return %arg0, %c0_i32 : i32, i32
  }
}

</mosaic_0001>

<bundles_post_ra>
// kernel: nest_mlp.1
= control target key start
LH: loop header
LB: loop body
LE: loop exit
PB: predicated region body
PF: predicated region fallthrough
CT: control target
= control target key end

     0   :  { %v558_v0 = vmov 0.0|0.0   ;;  %vm559_vm0 = vmmov 0   ;;  %v560_v4 = vmov 0.0   ;;  %s764_s1 = inlined_call_operand.vmem [shape: f32[3,128,128], index: 1, kind: input, shape index: {}]   ;;  %s765_s0 = inlined_call_operand.vmem [shape: f32[8,128], index: 0, kind: input, shape index: {}]   ;;  %s766_s2 = inlined_call_operand.vmem [shape: f32[8,128], index: 2, kind: input, shape index: {}]   ;;  %s767_s3 = inlined_call_operand.vmem [shape: f32[8,128], index: 3, kind: output, shape index: {}]  }
   0x1   :  { %483 = vmatprep.subr.bf16.mxu0 %v558_v0  ;;  %v16_v1 = vld [vmem:[%s764_s1] sm:$0xff]  ;;  %v17_v2 = vld [vmem:[%s764_s1 + $0x8] sm:$0xff]  ;;  %v18_v3 = vld [vmem:[%s764_s1 + $0x10] sm:$0xff]  ;;  %410 = vmatprep.mubr.msk.f32.mxu0 %vm559_vm0, %v560_v4 }
   0x2   :  { %v484_v5 = vpack.c.bf16 %v17_v2, %v16_v1  ;;  %v19_v6 = vld [vmem:[%s764_s1 + $0x18] sm:$0xff]  ;;  %507 = vmatprep.subr.bf16.mxu1 %v558_v0  ;;  %445 = vmatprep.mubr.msk.f32.mxu1 %vm559_vm0, %v560_v4  ;;  %v20_v8 = vld [vmem:[%s764_s1 + $0x20] sm:$0xff]  ;;  %v21_v9 = vld [vmem:[%s764_s1 + $0x28] sm:$0xff] }
   0x3   :  { %v487_v7 = vpack.c.bf16 %v19_v6, %v18_v3  ;;  %v295_v10 = vld [vmem:[%s764_s1 + $0x80] sm:$0xff]  ;;  %v296_v11 = vld [vmem:[%s764_s1 + $0x88] sm:$0xff]  ;;  %v297_v12 = vld [vmem:[%s764_s1 + $0x90] sm:$0xff]  ;;  %v490_v14 = vpack.c.bf16 %v21_v9, %v20_v8  ;;  %v32_v9 = vlaneseq }
   0x4   :  { %485 = vmatpush3.bf16.msra.mxu0 %v484_v5  ;;  %v298_v13 = vld [vmem:[%s764_s1 + $0x98] sm:$0xff]  ;;  %v508_v15 = vpack.c.bf16 %v296_v11, %v295_v10  ;;  %v22_v16 = vld [vmem:[%s764_s1 + $0x30] sm:$0xff]  ;;  %v299_v19 = vld [vmem:[%s764_s1 + $0xa0] sm:$0xff] }
   0x5   :  { %486 = vmatprep.subr.bf16.mxu0 %v558_v0  ;;  %v23_v17 = vld [vmem:[%s764_s1 + $0x38] sm:$0xff]  ;;  %v511_v18 = vpack.c.bf16 %v298_v13, %v297_v12  ;;  %v300_v20 = vld [vmem:[%s764_s1 + $0xa8] sm:$0xff]  ;;  %v24_v22 = vld [vmem:[%s764_s1 + $0x40] sm:$0xff]  ;;  %v33_v10 = vshrl.u32 %v32_v9, 7 }
   0x6   :  { %509 = vmatpush3.bf16.msra.mxu1 %v508_v15  ;;  %v493_v21 = vpack.c.bf16 %v23_v17, %v22_v16  ;;  %v25_v23 = vld [vmem:[%s764_s1 + $0x48] sm:$0xff]  ;;  %v514_v24 = vpack.c.bf16 %v300_v20, %v299_v19  ;;  %v301_v25 = vld [vmem:[%s764_s1 + $0xb0] sm:$0xff]  ;;  %v302_v26 = vld [vmem:[%s764_s1 + $0xb8] sm:$0xff] }
   0x7   :  { %510 = vmatprep.subr.bf16.mxu1 %v558_v0  ;;  %v496_v27 = vpack.c.bf16 %v25_v23, %v24_v22  ;;  %v26_v28 = vld [vmem:[%s764_s1 + $0x50] sm:$0xff]  ;;  %v27_v29 = vld [vmem:[%s764_s1 + $0x58] sm:$0xff]  ;;  %v517_v30 = vpack.c.bf16 %v302_v26, %v301_v25  ;;  %v303_v31 = vld [vmem:[%s764_s1 + $0xc0] sm:$0xff]  ;;  %v34_v11 = vsub.s32 0, %v33_v10  ;;  %v126_v20 = vsub.s32 1, %v33_v10 }
   0x8   :  { %488 = vmatpush3.bf16.msra.mxu0 %v487_v7  ;;  %v304_v32 = vld [vmem:[%s764_s1 + $0xc8] sm:$0xff]  ;;  %v499_v33 = vpack.c.bf16 %v27_v29, %v26_v28  ;;  %v28_v34 = vld [vmem:[%s764_s1 + $0x60] sm:$0xff]  ;;  %v305_v37 = vld [vmem:[%s764_s1 + $0xd0] sm:$0xff]  ;;  %v218_v26 = vsub.s32 2, %v33_v10 }
   0x9   :  { %489 = vmatprep.subr.bf16.mxu0 %v558_v0  ;;  %v29_v35 = vld [vmem:[%s764_s1 + $0x68] sm:$0xff]  ;;  %v520_v36 = vpack.c.bf16 %v304_v32, %v303_v31  ;;  %v306_v38 = vld [vmem:[%s764_s1 + $0xd8] sm:$0xff]  ;;  %v30_v40 = vld [vmem:[%s764_s1 + $0x70] sm:$0xff] }
   0xa   :  { %512 = vmatpush3.bf16.msra.mxu1 %v511_v18  ;;  %v502_v39 = vpack.c.bf16 %v29_v35, %v28_v34  ;;  %v31_v41 = vld [vmem:[%s764_s1 + $0x78] sm:$0xff]  ;;  %v523_v42 = vpack.c.bf16 %v306_v38, %v305_v37  ;;  %v307_v43 = vld [vmem:[%s764_s1 + $0xe0] sm:$0xff]  ;;  %v308_v44 = vld [vmem:[%s764_s1 + $0xe8] sm:$0xff] }
   0xb   :  { %513 = vmatprep.subr.bf16.mxu1 %v558_v0  ;;  %v505_v45 = vpack.c.bf16 %v31_v41, %v30_v40  ;;  %v526_v46 = vpack.c.bf16 %v308_v44, %v307_v43  ;;  %v14_v47 = vld [vmem:[%s765_s0] sm:$0xff]  ;;  %v309_v48 = vld [vmem:[%s764_s1 + $0xf0] sm:$0xff]  ;;  %v310_v49 = vld [vmem:[%s764_s1 + $0xf8] sm:$0xff] }
   0xc   :  { %491 = vmatpush3.bf16.msra.mxu0 %v490_v14  ;;  %v529_v50 = vpack.c.bf16 %v310_v49, %v309_v48  ;;  %v311_v51 = vld [vmem:[%s764_s1 + $0x100] sm:$0xff]  ;;  %v312_v52 = vld [vmem:[%s764_s1 + $0x108] sm:$0xff]  ;;  %v313_v53 = vld [vmem:[%s764_s1 + $0x110] sm:$0xff] }
   0xd   :  { %492 = vmatprep.subr.bf16.mxu0 %v558_v0  ;;  %v532_v54 = vpack.c.bf16 %v312_v52, %v311_v51  ;;  %v314_v55 = vld [vmem:[%s764_s1 + $0x118] sm:$0xff]  ;;  %v315_v57 = vld [vmem:[%s764_s1 + $0x120] sm:$0xff]  ;;  %v316_v58 = vld [vmem:[%s764_s1 + $0x128] sm:$0xff] }
   0xe   :  { %515 = vmatpush3.bf16.msra.mxu1 %v514_v24  ;;  %v535_v56 = vpack.c.bf16 %v314_v55, %v313_v53  ;;  %v538_v59 = vpack.c.bf16 %v316_v58, %v315_v57  ;;  %v317_v60 = vld [vmem:[%s764_s1 + $0x130] sm:$0xff]  ;;  %v318_v61 = vld [vmem:[%s764_s1 + $0x138] sm:$0xff]  ;;  %v319_v63 = vld [vmem:[%s764_s1 + $0x140] sm:$0xff] }
   0xf   :  { %516 = vmatprep.subr.bf16.mxu1 %v558_v0  ;;  %v541_v62 = vpack.c.bf16 %v318_v61, %v317_v60  ;;  %v320_v1 = vld [vmem:[%s764_s1 + $0x148] sm:$0xff]  ;;  %v321_v3 = vld [vmem:[%s764_s1 + $0x150] sm:$0xff]  ;;  %v323_v6 = vld [vmem:[%s764_s1 + $0x160] sm:$0xff] }
  0x10   :  { %494 = vmatpush3.bf16.msra.mxu0 %v493_v21  ;;  %v544_v2 = vpack.c.bf16 %v320_v1, %v319_v63  ;;  %v324_v7 = vld [vmem:[%s764_s1 + $0x168] sm:$0xff]  ;;  %v15_v12 = vld [vmem:[%s766_s2] sm:$0xff]  ;;  %v325_v18 = vld [vmem:[%s764_s1 + $0x170] sm:$0xff] }
  0x11   :  { %495 = vmatprep.subr.bf16.mxu0 %v558_v0  ;;  %v550_v8 = vpack.c.bf16 %v324_v7, %v323_v6  ;;  %v35_v13 = vrot.slane %v15_v12, %v34_v11  ;;  %v127_v21 = vrot.slane %v15_v12, %v126_v20 }
  0x12   :  { %518 = vmatpush3.bf16.msra.mxu1 %v517_v30 }
  0x13   :  { %519 = vmatprep.subr.bf16.mxu1 %v558_v0 }
  0x14   :  { %497 = vmatpush3.bf16.msra.mxu0 %v496_v27  ;;  %v219_v27 = vrot.slane %v15_v12, %v218_v26 }
  0x15   :  { %498 = vmatprep.subr.bf16.mxu0 %v558_v0 }
  0x16   :  { %521 = vmatpush3.bf16.msra.mxu1 %v520_v36 }
  0x17   :  { %522 = vmatprep.subr.bf16.mxu1 %v558_v0 }
  0x18   :  { %500 = vmatpush3.bf16.msra.mxu0 %v499_v33 }
  0x19   :  { %501 = vmatprep.subr.bf16.mxu0 %v558_v0 }
  0x1a   :  { %524 = vmatpush3.bf16.msra.mxu1 %v523_v42 }
  0x1b   :  { %525 = vmatprep.subr.bf16.mxu1 %v558_v0 }
  0x1c   :  { %503 = vmatpush3.bf16.msra.mxu0 %v502_v39 }
  0x1d   :  { %504 = vmatprep.subr.bf16.mxu0 %v558_v0 }
  0x1e   :  { %527 = vmatpush3.bf16.msra.mxu1 %v526_v46 }
  0x1f   :  { %528 = vmatprep.subr.bf16.mxu1 %v558_v0 }
  0x20   :  { %506 = vmatpush3.bf16.msra.mxu0 %v505_v45 }
  0x21   :  { %531 = vmatprep.subr.bf16.mxu0 %v558_v0 }
  0x22   :  { %530 = vmatpush3.bf16.msra.mxu1 %v529_v50 }
  0x23   :  { %411 = vmatmul.mubr.f32.vlgmr.msra.gmra.mrb[0].mxu0 %v14_v47 }
  0x24   :  { %480 = vmatprep.mubr.msk.f32.mxu0 %vm559_vm0, %v560_v4  ;;  %533 = vmatpush3.bf16.msra.mxu0 %v532_v54  ;;  %v322_v4 = vld [vmem:[%s764_s1 + $0x158] sm:$0xff] }
  0x25   :  { %534 = vmatprep.subr.bf16.mxu0 %v558_v0  ;;  %v547_v5 = vpack.c.bf16 %v322_v4, %v321_v3 }
  0x28   :  { %536 = vmatpush3.bf16.msra.mxu0 %v535_v56 }
  0x29   :  { %537 = vmatprep.subr.bf16.mxu0 %v558_v0 }
  0x2c   :  { %539 = vmatpush3.bf16.msra.mxu0 %v538_v59 }
  0x2d   :  { %540 = vmatprep.subr.bf16.mxu0 %v558_v0 }
  0x30   :  { %542 = vmatpush3.bf16.msra.mxu0 %v541_v62 }
  0x31   :  { %543 = vmatprep.subr.bf16.mxu0 %v558_v0 }
  0x34   :  { %545 = vmatpush3.bf16.msra.mxu0 %v544_v2 }
  0x35   :  { %546 = vmatprep.subr.bf16.mxu0 %v558_v0 }
  0x38   :  { %548 = vmatpush3.bf16.msra.mxu0 %v547_v5 }
  0x39   :  { %549 = vmatprep.subr.bf16.mxu0 %v558_v0 }
  0x3c   :  { %551 = vmatpush3.bf16.msra.mxu0 %v550_v8 }
  0x3d   :  { %552 = vmatprep.subr.bf16.mxu0 %v558_v0  ;;  %v326_v0 = vld [vmem:[%s764_s1 + $0x178] sm:$0xff] }
  0x3e   :  { %v553_v19 = vpack.c.bf16 %v326_v0, %v325_v18 }
  0x40   :  { %554 = vmatpush3.bf16.msra.mxu0 %v553_v19 }
  0xf6   :  { %v102_v14 = vpop.f32.mrb[0].mxu0 }
  0xf7   :  { %v103_v15 = vadd.f32 %v102_v14, %v35_v13  ;;  %v412_v16 = vpop.f32.mrb[1].mxu0 }
  0xf9   :  { %v106_v17 = vmax.f32 %v103_v15, 0.0 }
  0xfb   :  { %446 = vmatmul.mubr.f32.vlgmr.msra.gmra.mrb[0].mxu1 %v106_v17 }
 0x1ce   :  { %v194_v22 = vpop.f32.mrb[0].mxu1 }
 0x1cf   :  { %v195_v23 = vadd.f32 %v194_v22, %v127_v21  ;;  %v447_v24 = vpop.f32.mrb[1].mxu1 }
 0x1d1   :  { %v198_v25 = vmax.f32 %v195_v23, 0.0 }
 0x1d3   :  { %481 = vmatmul.mubr.f32.vlgmr.msra.gmra.mrb[2].mxu0 %v198_v25 }
 0x2a6   :  { %v286_v28 = vpop.f32.mrb[2].mxu0 }
 0x2a7   :  { %v287_v29 = vadd.f32 %v286_v28, %v219_v27  ;;  %v482_v30 = vpop.f32.mrb[3].mxu0 }
 0x2a9   :  { %290 = vst [vmem:[%s767_s3] sm:$0xff] %v287_v29 }

</bundles_post_ra>
